<compile_context>
chip_gen: v5e
topology: v5e:2x2
jax: 0.10.0
libtpu: 0.0.40
codegen_flags: <defaults>
</compile_context>

<pallas_src>
import jax
import jax.numpy as jnp
from jax import lax
from jax.experimental import pallas as pl
from jax.experimental.pallas import tpu as pltpu


_MAX_TILE_N = 8192        # max rows/lanes of the N axis handled per grid step
_SINGLE_BLOCK_N = 256     # below this, one full-extent block (always layout-legal)


def _round_up(x, m):
    return ((x + m - 1) // m) * m


def _choose_tile_n(n):
    """N-axis tile. Small problems use a single full-extent block (block dim ==
    array dim is always legal). Otherwise a multiple of 128 (legal on both the
    lane and sublane axes), with >=2 grid steps so BlockSpec double-buffering
    overlaps DMAs with compute and the v7x megacore can split the 'parallel'
    axis, capped at _MAX_TILE_N to bound double-buffered VMEM."""
    if n <= _SINGLE_BLOCK_N:
        return n
    steps = max(2, pl.cdiv(n, _MAX_TILE_N))
    return _round_up(pl.cdiv(n, steps), 128)


def _make_kernel(x_is_transposed, transposed_output):
    def kernel(x_ref, w_ref, b_ref, o_ref):
        x = x_ref[...]
        w = w_ref[...]
        if transposed_output:
            # o: (s, tile_n) — lane-dense stores.
            if x_is_transposed:       # x: (ln, tile_n); MXU-native [K, N] RHS
                dims = (((1,), (0,)), ((), ()))
            else:                     # x: (tile_n, ln)
                dims = (((1,), (1,)), ((), ()))
            acc = lax.dot_general(w, x, dimension_numbers=dims,
                                  preferred_element_type=jnp.float32)
        else:
            # o: (tile_n, s) — module-native layout, no post-kernel transpose.
            if x_is_transposed:       # x: (ln, tile_n)
                dims = (((0,), (1,)), ((), ()))
            else:                     # x: (tile_n, ln)
                dims = (((1,), (1,)), ((), ()))
            acc = lax.dot_general(x, w, dimension_numbers=dims,
                                  preferred_element_type=jnp.float32)
        acc = acc + b_ref[...]        # f32 bias add (broadcast), EUP/VPU slack
        o_ref[...] = jnp.tanh(acc).astype(o_ref.dtype)
    return kernel


def rou_forward(x, w, b, *, x_is_transposed=False, transposed_output=False,
                tile_n=None, out_dtype=None):
    """tanh(X @ W^T + b).

    x: (N, ln), or (ln, N) if x_is_transposed=True (lane-dense fast path:
       with ln=32 < 128 lanes, the (N, ln) f32 layout carries ~4x lane padding
       on every HBM read, so prefer handing over X^T when the producer can).
    w: (s, ln)  (PyTorch nn.Linear layout);  b: (s,).
    Returns (N, s), or (s, N) if transposed_output=True (lane-dense stores).
    out_dtype: e.g. jnp.bfloat16 to halve output write traffic; accumulation,
       bias add and tanh stay float32 in-kernel.
    """
    if x_is_transposed:
        ln, N = x.shape
    else:
        N, ln = x.shape
    s, ln_w = w.shape
    assert ln_w == ln, (w.shape, x.shape)
    assert b.shape == (s,), b.shape

    if out_dtype is None:
        out_dtype = x.dtype
    if tile_n is None:
        tile_n = _choose_tile_n(N)
    else:
        tile_n = min(tile_n, N)
        if tile_n < N:
            tile_n = _round_up(tile_n, 128)   # legal on lane and sublane axes
    grid = (pl.cdiv(N, tile_n),)              # ragged tail handled by Pallas masking

    # Tiny (s*ln) weight cast so the MXU sees a uniform dtype; x is NOT touched
    # in the wrapper (no hidden extra HBM pass over the dominant stream).
    w_in = w if w.dtype == x.dtype else w.astype(x.dtype)

    if x_is_transposed:
        x_spec = pl.BlockSpec((ln, tile_n), lambda i: (0, i))
    else:
        x_spec = pl.BlockSpec((tile_n, ln), lambda i: (i, 0))
    w_spec = pl.BlockSpec((s, ln), lambda i: (0, 0))          # resident

    if transposed_output:
        b_arr = b.reshape(s, 1).astype(jnp.float32)
        b_spec = pl.BlockSpec((s, 1), lambda i: (0, 0))
        out_shape = jax.ShapeDtypeStruct((s, N), out_dtype)
        out_spec = pl.BlockSpec((s, tile_n), lambda i: (0, i))
    else:
        b_arr = b.reshape(1, s).astype(jnp.float32)
        b_spec = pl.BlockSpec((1, s), lambda i: (0, 0))
        out_shape = jax.ShapeDtypeStruct((N, s), out_dtype)
        out_spec = pl.BlockSpec((tile_n, s), lambda i: (i, 0))

    # Advisory cost hint that accounts for the lane-padded layouts actually moved.
    lane = 128
    in_item = jnp.dtype(x.dtype).itemsize
    out_item = jnp.dtype(out_dtype).itemsize
    x_bytes = in_item * (ln * _round_up(N, lane) if x_is_transposed
                         else N * _round_up(ln, lane))
    o_bytes = out_item * (s * _round_up(N, lane) if transposed_output
                          else N * _round_up(s, lane))
    cost = pl.CostEstimate(
        flops=2 * N * ln * s,
        transcendentals=N * s,
        bytes_accessed=x_bytes + o_bytes + in_item * s * ln + 4 * s,
    )

    return pl.pallas_call(
        _make_kernel(x_is_transposed, transposed_output),
        out_shape=out_shape,
        grid=grid,
        in_specs=[x_spec, w_spec, b_spec],
        out_specs=out_spec,
        compiler_params=pltpu.CompilerParams(
            dimension_semantics=("parallel",),        # megacore sharding on v7x
            vmem_limit_bytes=32 * 1024 * 1024,        # 8192-row padded-X tiles on v5e
        ),
        cost_estimate=cost,
    )(x, w_in, b_arr)


if __name__ == "__main__":
    # Module config: Rou(ln, s) -> Linear(in_features=ln, out_features=s)
    ln, s = 32, 16
    key = jax.random.PRNGKey(0)
    kx1, kx2, kw, kb = jax.random.split(key, 4)

    # Deterministic synthetic parameters (PyTorch nn.Linear shapes: W (s, ln), b (s,))
    bound = 1.0 / (ln ** 0.5)
    w = jax.random.uniform(kw, (s, ln), minval=-bound, maxval=bound, dtype=jnp.float32)
    b = jax.random.uniform(kb, (s,), minval=-bound, maxval=bound, dtype=jnp.float32)

    # Case 1: module-semantics path, tiny N (single full-extent block).
    N1 = 8
    x1 = jax.random.normal(kx1, (N1, ln), dtype=jnp.float32)
    out1 = jax.block_until_ready(rou_forward(x1, w, b))
    ref1 = jnp.tanh(x1 @ w.T + b)
    assert out1.shape == (N1, s)
    assert jnp.allclose(out1, ref1, atol=1e-5, rtol=1e-5)

    # Case 2: ragged N, NO wrapper padding — 2 'parallel' grid steps, Pallas
    # masks the tail block; kernel writes (N, s) directly (no XLA transpose).
    N2 = 300
    x2 = jax.random.normal(kx2, (N2, ln), dtype=jnp.float32)
    out2 = jax.block_until_ready(rou_forward(x2, w, b))
    ref2 = jnp.tanh(x2 @ w.T + b)
    assert out2.shape == (N2, s)
    assert jnp.allclose(out2, ref2, atol=1e-5, rtol=1e-5)

    # Case 3: lane-dense fast path — producer supplies X^T (ln, N), consumer
    # accepts (s, N); both HBM streams avoid lane padding entirely.
    x2_t = x2.T   # demo only; a real producer would emit this layout directly
    out3 = jax.block_until_ready(
        rou_forward(x2_t, w, b, x_is_transposed=True, transposed_output=True))
    assert out3.shape == (s, N2)
    assert jnp.allclose(out3.T, ref2, atol=1e-5, rtol=1e-5)

    # Case 4: bf16 output halves write traffic; compute/bias/tanh stay f32.
    out4 = jax.block_until_ready(rou_forward(x2, w, b, out_dtype=jnp.bfloat16))
    assert out4.dtype == jnp.bfloat16
    assert jnp.allclose(out4.astype(jnp.float32), ref2, atol=2e-2, rtol=2e-2)

    print("KERNEL_OK")
</pallas_src>

<mosaic_0001>
module attributes {stable_mosaic.version = 11 : i64} {
  func.func @kernel(%arg0: i32, %arg1: memref<8x32xf32, #tpu.memory_space<vmem>>, %arg2: memref<16x32xf32, #tpu.memory_space<vmem>>, %arg3: memref<1x16xf32, #tpu.memory_space<vmem>>, %arg4: memref<8x16xf32, #tpu.memory_space<vmem>>) attributes {dimension_semantics = [#tpu.dimension_semantics<parallel>], iteration_bounds = array<i64: 1>, scalar_prefetch = 0 : i64, scratch_operands = 0 : i64, tpu.core_type = #tpu.core_type<tc>, window_params = [{transform_indices = @transform_0, window_bounds = array<i64: 8, 32>}, {pipeline_mode = #tpu.pipeline_mode<synchronous>, transform_indices = @transform_1, window_bounds = array<i64: 16, 32>}, {pipeline_mode = #tpu.pipeline_mode<synchronous>, transform_indices = @transform_2, window_bounds = array<i64: 1, 16>}, {transform_indices = @transform_3, window_bounds = array<i64: 8, 16>}]} {
    %c0 = arith.constant 0 : index
    %c0_0 = arith.constant 0 : index
    %0 = vector.load %arg1[%c0, %c0_0] : memref<8x32xf32, #tpu.memory_space<vmem>>, vector<8x32xf32>
    %c0_1 = arith.constant 0 : index
    %c0_2 = arith.constant 0 : index
    %1 = vector.load %arg2[%c0_1, %c0_2] : memref<16x32xf32, #tpu.memory_space<vmem>>, vector<16x32xf32>
    %cst = arith.constant dense<0.000000e+00> : vector<8x16xf32>
    %2 = tpu.matmul %0, %1, %cst {dimension_numbers = #tpu.dot_dimension_numbers<[1], [1], [0], [0], [0, 0, 1, 0], [], []>} : vector<8x32xf32>, vector<16x32xf32>, vector<8x16xf32> -> vector<8x16xf32>
    %c0_3 = arith.constant 0 : index
    %c0_4 = arith.constant 0 : index
    %3 = vector.load %arg3[%c0_3, %c0_4] : memref<1x16xf32, #tpu.memory_space<vmem>>, vector<1x16xf32>
    %4 = vector.broadcast %3 : vector<1x16xf32> to vector<8x16xf32>
    %5 = arith.addf %2, %4 : vector<8x16xf32>
    %6 = math.tanh %5 : vector<8x16xf32>
    %c0_5 = arith.constant 0 : index
    %c0_6 = arith.constant 0 : index
    %7 = vector.load %arg4[%c0_5, %c0_6] : memref<8x16xf32, #tpu.memory_space<vmem>>, vector<8x16xf32>
    tpu.vector_store %arg4[%c0_5, %c0_6], %6 {strides = array<i32>} : memref<8x16xf32, #tpu.memory_space<vmem>>, vector<8x16xf32>,
    return
  }
  func.func @transform_0(%arg0: i32) -> (i32, i32) {
    %c0_i32 = arith.constant 0 : i32
    %c0_i32_0 = arith.constant 0 : i32
    return %arg0, %c0_i32 : i32, i32
  }
  func.func @transform_1(%arg0: i32) -> (i32, i32) {
    %c0_i32 = arith.constant 0 : i32
    %c0_i32_0 = arith.constant 0 : i32
    %c0_i32_1 = arith.constant 0 : i32
    return %c0_i32, %c0_i32_0 : i32, i32
  }
  func.func @transform_2(%arg0: i32) -> (i32, i32) {
    %c0_i32 = arith.constant 0 : i32
    %c0_i32_0 = arith.constant 0 : i32
    %c0_i32_1 = arith.constant 0 : i32
    return %c0_i32, %c0_i32_0 : i32, i32
  }
  func.func @transform_3(%arg0: i32) -> (i32, i32) {
    %c0_i32 = arith.constant 0 : i32
    %c0_i32_0 = arith.constant 0 : i32
    return %arg0, %c0_i32 : i32, i32
  }
}

</mosaic_0001>

<bundles_post_ra>
// kernel: tpu_custom_call.1
= control target key start
LH: loop header
LB: loop body
LE: loop exit
PB: predicated region body
PF: predicated region fallthrough
CT: control target
= control target key end

     0   :  { %8 = vsyncpa [#allocation3], 0  ;;  %s229_s0 = inlined_call_operand.hbm [shape: f32[8,32], index: 0, kind: input, shape index: {}]   ;;  %s230_s1 = inlined_call_operand.hbm [shape: f32[16,32], index: 1, kind: input, shape index: {}]   ;;  %s231_s2 = inlined_call_operand.vmem [shape: f32[1,16], index: 2, kind: input, shape index: {}]   ;;  %s232_s3 = inlined_call_operand.hbm [shape: f32[8,16], index: 3, kind: output, shape index: {}]  }
   0x1   :  { %9 = vsyncpa [#allocation6], 0 }
   0x2   :  { %10 = vsyncpa [#allocation4], 0  ;;  %s16_s14 = sshll.u32 %s229_s0, 4  ;;  %s192_s15 = smov [#allocation2]   ;;  %s17_s14 = int_to_ptr.hbm [resolvable:$true] %s16_s14 }
   0x3   :  { %s18_s16 = sshll.u32 %s192_s15, 4  ;;  %s26_s19 = sshll.u32 %s230_s1, 4  ;;  %s19_s16 = int_to_ptr.vmem [resolvable:$true] %s18_s16  ;;  %s27_s19 = int_to_ptr.hbm [resolvable:$true] %s26_s19 }
   0x4   :  { %21 = dma.hbm_to_vmem [thread:$0]  %s17_s14, 128, %s19_s16, [#allocation3]  }
   0x5   :  { %s193_s20 = smov [#allocation5]   ;;  %s194_s22 = smov 128  }
   0x6   :  { %s28_s21 = sshll.u32 %s193_s20, 4  ;;  %s195_s23 = smov 8   ;;  %s29_s21 = int_to_ptr.vmem [resolvable:$true] %s28_s21 }
   0x7   :  { %34 = dma.hbm_to_vmem [thread:$0]  %s27_s19, 256, %s29_s21, [#allocation6], %s194_s22, %s194_s22, %s195_s23  }
   0x8   :  { %186 = dma.done.wait [#allocation3], 128  }
   0x9   :  { %187 = vsyncadd [#allocation3], 4294967168 }
   0xa   :  { %188 = dma.done.wait [#allocation6], 256  }
   0xb   :  { %189 = vsyncadd [#allocation6], 4294967040  ;;  %vm52_vm0 = vcmask 261120   ;;  %v47_v0 = vld [vmem:[#allocation5 + $0x8] sm:$0xff]  ;;  %v46_v1 = vld [vmem:[#allocation5] sm:$0xff]  ;;  %s196_s24 = smov [#allocation7]  }
   0xc   :  { %103 = vmatpush.xpose.msk.msra.mxu0 %vm52_vm0, %v47_v0  ;;  %v45_v2 = vld [vmem:[#allocation2] sm:$0xff]  ;;  %s90_s25 = sshll.u32 %s196_s24, 4  ;;  %s92_s28 = sshll.u32 %s232_s3, 4  ;;  %vm83_vm1 = vcmask 130048   ;;  %s91_s25 = int_to_ptr.vmem [resolvable:$true] %s90_s25  ;;  %s93_s28 = int_to_ptr.hbm [resolvable:$true] %s92_s28 }
   0xd   :  { %v111_v3 = vld [vmem:[%s231_s2] ss:$0 sm:$0xff] }
  0x10   :  { %104 = vmatpush.xpose.msk.msra.mxu0 %vm52_vm0, %v46_v1 }
  0x13   :  { %105 = vmatmul.msk.f32.vlgmr.msra.gmra.mxu0 %vm52_vm0, %v45_v2 }
  0x90   :  { %v79_v4 = vpop.f32.mrf.mxu0 }
  0x91   :  { %v80_v5 = vadd.f32 %v111_v3, %v79_v4 }
  0x93   :  { %112 = vtanh.f32 %v80_v5 }
  0x99   :  { %v113_v6 = vpop.eup %112 }
  0x9a   :  { %84 = vst.msk [vmem:[#allocation7] sm:$0xff] %vm83_vm1, %v113_v6 }
  0x9b   :  { %95 = dma.vmem_to_hbm [thread:$0]  %s91_s25, 128, %s93_s28, [#allocation4]  }
  0x9c   :  { %190 = dma.done.wait [#allocation4], 128  }
  0x9d   :  { %191 = vsyncadd [#allocation4], 4294967168 }
  0x9e   :  { %100 = vsyncpa [#allocation3], 1 }
  0x9f   :  { %101 = vsyncpa [#allocation6], 1 }
  0xa0   :  { %102 = vsyncpa [#allocation4], 1 }

</bundles_post_ra>
